<compile_context>
chip_gen: v7x
topology: tpu7x:2x2x1
jax: 0.10.0
libtpu: 0.0.40
codegen_flags: <defaults>
</compile_context>

<pallas_src>
import jax
import jax.numpy as jnp
from jax.experimental import pallas as pl
from jax.experimental.pallas import tpu as pltpu


def _sentiment_linear_kernel(x_ref, w1_ref, b1_ref, w2_ref, b2_ref, o_ref):
    # First linear + ReLU (MXU matmul with f32 accumulate; bias + max on VPU).
    h = jnp.dot(x_ref[...], w1_ref[...], preferred_element_type=jnp.float32)
    h = jnp.maximum(h + b1_ref[...], 0.0)            # (TB, Dp) + (1, Dp)
    # TODO(synk): training-mode dropout (p=linear_dropout) not applied; eval-mode identity.
    # Second linear.  astype is a no-op for f32 weights; if bf16 weights are
    # fed it casts the ReLU activations to bf16 for a single-pass MXU matmul
    # (f32 accumulate is kept via preferred_element_type).
    y = jnp.dot(h.astype(w2_ref.dtype), w2_ref[...],
                preferred_element_type=jnp.float32)
    o_ref[...] = (y + b2_ref[...]).astype(o_ref.dtype)


def _round_up(n, m):
    return (n + m - 1) // m * m


def _nbytes(a):
    return a.size * jnp.dtype(a.dtype).itemsize


def sentiment_linear(x, w1, b1, w2, b2, *, block_batch=1024):
    """Fused MLP: relu(x @ w1 + b1) @ w2 + b2.

    x:  (B, 2*hidden_dim)
    w1: (2*hidden_dim, sentiment_linear_dim)
    b1: (sentiment_linear_dim,)
    w2: (sentiment_linear_dim, output_dim)
    b2: (output_dim,)
    """
    B, Din = x.shape
    D = w1.shape[1]
    O = w2.shape[1]

    # --- Batch tiling ---------------------------------------------------
    # Roughly-equal tiles bounded by block_batch (keeps tail padding to a few
    # rows), and at least 2 grid steps for non-trivial batches so v7x's two
    # TensorCores both get work on the "parallel" axis.
    n_tiles = pl.cdiv(B, block_batch)
    if n_tiles < 2 and B >= 256:
        n_tiles = 2
    n_tiles = max(n_tiles, 1)
    TB = _round_up(pl.cdiv(B, n_tiles), 8)
    B_p = n_tiles * TB

    # Row-pad x only when needed (no feature padding — x is the dominant HBM
    # stream and is passed through untouched when tile-aligned).
    if B_p == B:
        xp = x
    else:
        xp = jnp.pad(x, ((0, B_p - B), (0, 0)))

    # --- Weight/bias prep -------------------------------------------------
    # Pad only the tiny hidden dim D to 128 lanes (weights/bias only; a few
    # KiB, DMA'd once).  Padded W1 cols + zero b1 padding give relu(0)=0 in
    # the padded h columns; padded W2 rows are zero -> numerically inert.
    D_p = _round_up(D, 128)
    if D_p == D:
        w1p = w1
        b1p = b1.reshape(1, D)
        w2p = w2
    else:
        w1p = jnp.zeros((Din, D_p), w1.dtype).at[:, :D].set(w1)
        b1p = jnp.zeros((1, D_p), b1.dtype).at[0, :D].set(b1)
        w2p = jnp.zeros((D_p, O), w2.dtype).at[:D, :].set(w2)
    b2p = b2.reshape(1, O)

    grid = (n_tiles,)

    out_itemsize = jnp.dtype(x.dtype).itemsize
    cost = pl.CostEstimate(
        flops=2 * B_p * (Din * D_p + D_p * O),
        transcendentals=0,
        bytes_accessed=(_nbytes(xp) + _nbytes(w1p) + _nbytes(b1p)
                        + _nbytes(w2p) + _nbytes(b2p) + B_p * O * out_itemsize),
    )

    out = pl.pallas_call(
        _sentiment_linear_kernel,
        out_shape=jax.ShapeDtypeStruct((B_p, O), x.dtype),
        grid=grid,
        in_specs=[
            # x: batch-tiled, feature dim unpadded (block last-dim == full dim).
            pl.BlockSpec((TB, Din), lambda i: (i, 0)),
            # Weights / biases: constant index_map -> stay VMEM-resident.
            pl.BlockSpec((Din, D_p), lambda i: (0, 0)),
            pl.BlockSpec((1, D_p), lambda i: (0, 0)),
            pl.BlockSpec((D_p, O), lambda i: (0, 0)),
            pl.BlockSpec((1, O), lambda i: (0, 0)),
        ],
        # Output dim left unpadded: (TB, O) block == full last dim, no padded
        # writeback and no slice pass over a 32x-inflated buffer.
        out_specs=pl.BlockSpec((TB, O), lambda i: (i, 0)),
        compiler_params=pltpu.CompilerParams(
            dimension_semantics=("parallel",)),
        cost_estimate=cost,
    )(xp, w1p, b1p, w2p, b2p)

    return out[:B] if B_p != B else out


def _reference(x, w1, b1, w2, b2):
    h = jnp.maximum(x @ w1 + b1, 0.0)
    return h @ w2 + b2


if __name__ == "__main__":
    # Module hyperparameters (small, consistent with the forward pass).
    hidden_dim = 32              # -> input features = 2 * hidden_dim = 64
    sentiment_linear_dim = 32
    output_dim = 4
    batch = 8

    key = jax.random.PRNGKey(0)
    kx, kw1, kb1, kw2, kb2 = jax.random.split(key, 5)

    x = jax.random.normal(kx, (batch, 2 * hidden_dim), dtype=jnp.float32)

    # Deterministic parameter init (uniform like nn.Linear default ranges).
    lim1 = 1.0 / jnp.sqrt(2.0 * hidden_dim)
    w1 = jax.random.uniform(kw1, (2 * hidden_dim, sentiment_linear_dim),
                            minval=-lim1, maxval=lim1, dtype=jnp.float32)
    b1 = jax.random.uniform(kb1, (sentiment_linear_dim,),
                            minval=-lim1, maxval=lim1, dtype=jnp.float32)
    lim2 = 1.0 / jnp.sqrt(float(sentiment_linear_dim))
    w2 = jax.random.uniform(kw2, (sentiment_linear_dim, output_dim),
                            minval=-lim2, maxval=lim2, dtype=jnp.float32)
    b2 = jax.random.uniform(kb2, (output_dim,),
                            minval=-lim2, maxval=lim2, dtype=jnp.float32)

    out = sentiment_linear(x, w1, b1, w2, b2)
    out = jax.block_until_ready(out)

    ref = _reference(x, w1, b1, w2, b2)
    assert out.shape == (batch, output_dim)
    assert jnp.allclose(out, ref, atol=1e-5, rtol=1e-5)

    print("KERNEL_OK")
</pallas_src>

<mosaic_0001>
module attributes {stable_mosaic.version = 11 : i64} {
  func.func @_sentiment_linear_kernel(%arg0: i32, %arg1: memref<8x64xf32, #tpu.memory_space<vmem>>, %arg2: memref<64x128xf32, #tpu.memory_space<vmem>>, %arg3: memref<1x128xf32, #tpu.memory_space<vmem>>, %arg4: memref<128x4xf32, #tpu.memory_space<vmem>>, %arg5: memref<1x4xf32, #tpu.memory_space<vmem>>, %arg6: memref<8x4xf32, #tpu.memory_space<vmem>>) attributes {dimension_semantics = [#tpu.dimension_semantics<parallel>], iteration_bounds = array<i64: 1>, scalar_prefetch = 0 : i64, scratch_operands = 0 : i64, tpu.core_type = #tpu.core_type<tc>, window_params = [{transform_indices = @transform_0, window_bounds = array<i64: 8, 64>}, {pipeline_mode = #tpu.pipeline_mode<synchronous>, transform_indices = @transform_1, window_bounds = array<i64: 64, 128>}, {pipeline_mode = #tpu.pipeline_mode<synchronous>, transform_indices = @transform_2, window_bounds = array<i64: 1, 128>}, {pipeline_mode = #tpu.pipeline_mode<synchronous>, transform_indices = @transform_3, window_bounds = array<i64: 128, 4>}, {pipeline_mode = #tpu.pipeline_mode<synchronous>, transform_indices = @transform_4, window_bounds = array<i64: 1, 4>}, {transform_indices = @transform_5, window_bounds = array<i64: 8, 4>}]} {
    %c0 = arith.constant 0 : index
    %c0_0 = arith.constant 0 : index
    %0 = vector.load %arg1[%c0, %c0_0] : memref<8x64xf32, #tpu.memory_space<vmem>>, vector<8x64xf32>
    %c0_1 = arith.constant 0 : index
    %c0_2 = arith.constant 0 : index
    %1 = vector.load %arg2[%c0_1, %c0_2] : memref<64x128xf32, #tpu.memory_space<vmem>>, vector<64x128xf32>
    %cst = arith.constant dense<0.000000e+00> : vector<8x128xf32>
    %2 = tpu.matmul %0, %1, %cst {dimension_numbers = #tpu.dot_dimension_numbers<[1], [0], [0], [1], [0, 0, 1, 1], [], []>} : vector<8x64xf32>, vector<64x128xf32>, vector<8x128xf32> -> vector<8x128xf32>
    %c0_3 = arith.constant 0 : index
    %c0_4 = arith.constant 0 : index
    %3 = vector.load %arg3[%c0_3, %c0_4] : memref<1x128xf32, #tpu.memory_space<vmem>>, vector<1x128xf32>
    %4 = vector.broadcast %3 : vector<1x128xf32> to vector<8x128xf32>
    %5 = arith.addf %2, %4 : vector<8x128xf32>
    %cst_5 = arith.constant 0.000000e+00 : f32
    %6 = vector.broadcast %cst_5 : f32 to vector<8x128xf32>
    %7 = arith.maximumf %5, %6 : vector<8x128xf32>
    %c0_6 = arith.constant 0 : index
    %c0_7 = arith.constant 0 : index
    %8 = vector.load %arg4[%c0_6, %c0_7] : memref<128x4xf32, #tpu.memory_space<vmem>>, vector<128x4xf32>
    %cst_8 = arith.constant dense<0.000000e+00> : vector<8x4xf32>
    %9 = tpu.matmul %7, %8, %cst_8 {dimension_numbers = #tpu.dot_dimension_numbers<[1], [0], [0], [1], [0, 0, 1, 1], [], []>} : vector<8x128xf32>, vector<128x4xf32>, vector<8x4xf32> -> vector<8x4xf32>
    %c0_9 = arith.constant 0 : index
    %c0_10 = arith.constant 0 : index
    %10 = vector.load %arg5[%c0_9, %c0_10] : memref<1x4xf32, #tpu.memory_space<vmem>>, vector<1x4xf32>
    %11 = vector.broadcast %10 : vector<1x4xf32> to vector<8x4xf32>
    %12 = arith.addf %9, %11 : vector<8x4xf32>
    %c0_11 = arith.constant 0 : index
    %c0_12 = arith.constant 0 : index
    %13 = vector.load %arg6[%c0_11, %c0_12] : memref<8x4xf32, #tpu.memory_space<vmem>>, vector<8x4xf32>
    tpu.vector_store %arg6[%c0_11, %c0_12], %12 {strides = array<i32>} : memref<8x4xf32, #tpu.memory_space<vmem>>, vector<8x4xf32>,
    return
  }
  func.func @transform_0(%arg0: i32) -> (i32, i32) {
    %c0_i32 = arith.constant 0 : i32
    %c0_i32_0 = arith.constant 0 : i32
    return %arg0, %c0_i32 : i32, i32
  }
  func.func @transform_1(%arg0: i32) -> (i32, i32) {
    %c0_i32 = arith.constant 0 : i32
    %c0_i32_0 = arith.constant 0 : i32
    %c0_i32_1 = arith.constant 0 : i32
    return %c0_i32, %c0_i32_0 : i32, i32
  }
  func.func @transform_2(%arg0: i32) -> (i32, i32) {
    %c0_i32 = arith.constant 0 : i32
    %c0_i32_0 = arith.constant 0 : i32
    %c0_i32_1 = arith.constant 0 : i32
    return %c0_i32, %c0_i32_0 : i32, i32
  }
  func.func @transform_3(%arg0: i32) -> (i32, i32) {
    %c0_i32 = arith.constant 0 : i32
    %c0_i32_0 = arith.constant 0 : i32
    %c0_i32_1 = arith.constant 0 : i32
    return %c0_i32, %c0_i32_0 : i32, i32
  }
  func.func @transform_4(%arg0: i32) -> (i32, i32) {
    %c0_i32 = arith.constant 0 : i32
    %c0_i32_0 = arith.constant 0 : i32
    %c0_i32_1 = arith.constant 0 : i32
    return %c0_i32, %c0_i32_0 : i32, i32
  }
  func.func @transform_5(%arg0: i32) -> (i32, i32) {
    %c0_i32 = arith.constant 0 : i32
    %c0_i32_0 = arith.constant 0 : i32
    return %arg0, %c0_i32 : i32, i32
  }
}

</mosaic_0001>

<bundles_post_ra>
// kernel: tpu_custom_call.1
= control target key start
LH: loop header
LB: loop body
LE: loop exit
PB: predicated region body
PF: predicated region fallthrough
CT: control target
= control target key end

     0   :  { %v332_v0 = vmov 0.0|0.0   ;;  %vm333_vm0 = vmmov 0   ;;  %v334_v4 = vmov 0.0   ;;  %vm36_vm1 = vcmask 523264   ;;  %s461_s1 = inlined_call_operand.vmem [shape: f32[64,128], index: 1, kind: input, shape index: {}]   ;;  %s462_s3 = inlined_call_operand.vmem [shape: f32[128,4], index: 3, kind: input, shape index: {}]   ;;  %s463_s0 = inlined_call_operand.vmem [shape: f32[8,64], index: 0, kind: input, shape index: {}]   ;;  %s464_s2 = inlined_call_operand.vmem [shape: f32[1,128], index: 2, kind: input, shape index: {}]   ;;  %s465_s4 = inlined_call_operand.vmem [shape: f32[1,4], index: 4, kind: input, shape index: {}]   ;;  %s466_s5 = inlined_call_operand.vmem [shape: f32[8,4], index: 5, kind: output, shape index: {}]  }
   0x1   :  { %293 = vmatprep.subr.bf16.mxu0 %v332_v0  ;;  %v21_v1 = vld [vmem:[%s461_s1] sm:$0xff]  ;;  %v22_v2 = vld [vmem:[%s461_s1 + $0x8] sm:$0xff]  ;;  %v23_v3 = vld [vmem:[%s461_s1 + $0x10] sm:$0xff]  ;;  %255 = vmatprep.mubr.msk.f32.mxu0 %vm333_vm0, %v334_v4  ;;  %vm204_vm2 = vcmask 31744  }
   0x2   :  { %v294_v5 = vpack.c.bf16 %v22_v2, %v21_v1  ;;  %v24_v6 = vld [vmem:[%s461_s1 + $0x18] sm:$0xff]  ;;  %305 = vmatprep.subr.bf16.mxu1 %v332_v0  ;;  %290 = vmatprep.mubr.msk.f32.mxu1 %vm333_vm0, %v334_v4  ;;  %v111_v8 = vld [vmem:[%s462_s3] sm:$0xff]  ;;  %v112_v9 = vld [vmem:[%s462_s3 + $0x8] sm:$0xff] }
   0x3   :  { %v297_v7 = vpack.c.bf16 %v24_v6, %v23_v3  ;;  %v113_v10 = vld [vmem:[%s462_s3 + $0x10] sm:$0xff]  ;;  %v25_v11 = vld [vmem:[%s461_s1 + $0x20] sm:$0xff]  ;;  %v26_v12 = vld [vmem:[%s461_s1 + $0x28] sm:$0xff]  ;;  %v306_v13 = vpack.c.bf16 %v112_v9, %v111_v8 }
   0x4   :  { %295 = vmatpush3.bf16.msra.mxu0 %v294_v5  ;;  %v114_v14 = vld [vmem:[%s462_s3 + $0x18] sm:$0xff]  ;;  %v300_v16 = vpack.c.bf16 %v26_v12, %v25_v11  ;;  %v115_v17 = vld [vmem:[%s462_s3 + $0x20] sm:$0xff]  ;;  %v116_v18 = vld [vmem:[%s462_s3 + $0x28] sm:$0xff] }
   0x5   :  { %296 = vmatprep.subr.bf16.mxu0 %v332_v0  ;;  %307 = vmatpush3.bf16.msra.mxu1 %v306_v13  ;;  %v309_v15 = vpack.c.bf16 %v114_v14, %v113_v10  ;;  %v27_v19 = vld [vmem:[%s461_s1 + $0x30] sm:$0xff]  ;;  %v28_v20 = vld [vmem:[%s461_s1 + $0x38] sm:$0xff]  ;;  %v312_v21 = vpack.c.bf16 %v116_v18, %v115_v17  ;;  %v20_v26 = vld [vmem:[%s463_s0] sm:$0xff] }
   0x6   :  { %308 = vmatprep.subr.bf16.mxu1 %v332_v0  ;;  %v303_v22 = vpack.c.bf16 %v28_v20, %v27_v19  ;;  %v117_v23 = vld [vmem:[%s462_s3 + $0x30] sm:$0xff]  ;;  %v118_v24 = vld [vmem:[%s462_s3 + $0x38] sm:$0xff]  ;;  %v119_v27 = vld [vmem:[%s462_s3 + $0x40] sm:$0xff] }
   0x7   :  { %v315_v25 = vpack.c.bf16 %v118_v24, %v117_v23  ;;  %v120_v28 = vld [vmem:[%s462_s3 + $0x48] sm:$0xff]  ;;  %v121_v30 = vld [vmem:[%s462_s3 + $0x50] sm:$0xff]  ;;  %v122_v31 = vld [vmem:[%s462_s3 + $0x58] sm:$0xff] }
   0x8   :  { %298 = vmatpush3.bf16.msra.mxu0 %v297_v7  ;;  %v318_v29 = vpack.c.bf16 %v120_v28, %v119_v27  ;;  %v321_v32 = vpack.c.bf16 %v122_v31, %v121_v30  ;;  %v123_v33 = vld [vmem:[%s462_s3 + $0x60] sm:$0xff]  ;;  %v124_v34 = vld [vmem:[%s462_s3 + $0x68] sm:$0xff]  ;;  %v125_v36 = vld [vmem:[%s462_s3 + $0x70] sm:$0xff] }
   0x9   :  { %299 = vmatprep.subr.bf16.mxu0 %v332_v0  ;;  %310 = vmatpush3.bf16.msra.mxu1 %v309_v15  ;;  %v324_v35 = vpack.c.bf16 %v124_v34, %v123_v33  ;;  %v126_v37 = vld [vmem:[%s462_s3 + $0x78] sm:$0xff]  ;;  %v210_v39 = vld [vmem:[%s464_s2] ss:$0 sm:$0xff] }
   0xa   :  { %311 = vmatprep.subr.bf16.mxu1 %v332_v0  ;;  %v327_v38 = vpack.c.bf16 %v126_v37, %v125_v36  ;;  %v212_v44 = vld [vmem:[%s465_s4] ss:$0 sm:$0xff] }
   0xc   :  { %301 = vmatpush3.bf16.msra.mxu0 %v300_v16 }
   0xd   :  { %302 = vmatprep.subr.bf16.mxu0 %v332_v0  ;;  %313 = vmatpush3.bf16.msra.mxu1 %v312_v21 }
   0xe   :  { %314 = vmatprep.subr.bf16.mxu1 %v332_v0 }
  0x10   :  { %304 = vmatpush3.bf16.msra.mxu0 %v303_v22 }
  0x11   :  { %316 = vmatpush3.bf16.msra.mxu1 %v315_v25 }
  0x12   :  { %317 = vmatprep.subr.bf16.mxu1 %v332_v0 }
  0x13   :  { %256 = vmatmul.mubr.msk.f32.vlgmr.msra.gmra.mrb[0].mxu0 %vm36_vm1, %v20_v26 }
  0x15   :  { %319 = vmatpush3.bf16.msra.mxu1 %v318_v29 }
  0x16   :  { %320 = vmatprep.subr.bf16.mxu1 %v332_v0 }
  0x19   :  { %322 = vmatpush3.bf16.msra.mxu1 %v321_v32 }
  0x1a   :  { %323 = vmatprep.subr.bf16.mxu1 %v332_v0 }
  0x1d   :  { %325 = vmatpush3.bf16.msra.mxu1 %v324_v35 }
  0x1e   :  { %326 = vmatprep.subr.bf16.mxu1 %v332_v0 }
  0x21   :  { %328 = vmatpush3.bf16.msra.mxu1 %v327_v38 }
  0xe6   :  { %v106_v40 = vpop.f32.mrb[0].mxu0 }
  0xe7   :  { %v107_v41 = vadd.f32 %v210_v39, %v106_v40  ;;  %v257_v42 = vpop.f32.mrb[1].mxu0 }
  0xe9   :  { %v110_v43 = vmax.f32 %v107_v41, 0.0 }
  0xeb   :  { %291 = vmatmul.mubr.f32.vlgmr.msra.gmra.mrb[0].mxu1 %v110_v43 }
 0x1be   :  { %v200_v45 = vpop.f32.mrb[0].mxu1 }
 0x1bf   :  { %v201_v46 = vadd.f32 %v212_v44, %v200_v45  ;;  %v292_v47 = vpop.f32.mrb[1].mxu1 }
 0x1c1   :  { %205 = vst.msk [vmem:[%s466_s5] sm:$0xff] %vm204_vm2, %v201_v46 }

</bundles_post_ra>
